<compile_context>
chip_gen: v5e
topology: v5e:2x2
jax: 0.10.0
libtpu: 0.0.40
codegen_flags: <defaults>
</compile_context>

<pallas_src>
import jax
import jax.numpy as jnp
from jax.experimental import pallas as pl
from jax.experimental.pallas import tpu as pltpu


def _round_up(v, m):
    return ((v + m - 1) // m) * m


def make_mlp_kernel(H0, H1, D_OUT):
    def mlp_kernel(x_ref, w0_ref, w1_ref, wo_ref, p_ref, o_ref):
        # Packed per-feature f32 params: row 0 = b0, 1 = b1', 2 = s1, 3 = t1, 4 = bo
        p = p_ref[...]
        b0 = p[0:1, :H0]
        b1 = p[1:2, :H1]
        s1 = p[2:3, :H1]
        t1 = p[3:4, :H1]
        bo = p[4:5, :D_OUT]

        # input layer: Linear -> ReLU   (BN0 affine already folded into w1/b1)
        h = jnp.dot(x_ref[...], w0_ref[...], preferred_element_type=jnp.float32)
        h = jnp.maximum(h + b0, 0.0)

        # hidden block: Linear(folded BN0) -> ReLU -> BatchNorm1d -> Dropout(id)
        h = jnp.dot(h.astype(jnp.bfloat16), w1_ref[...],
                    preferred_element_type=jnp.float32)
        h = jnp.maximum(h + b1, 0.0)
        h = h * s1 + t1
        # forward() applies self.relu(layer(out)) then dropout (identity)
        h = jnp.maximum(h, 0.0)

        # output layer
        out = jnp.dot(h.astype(jnp.bfloat16), wo_ref[...],
                      preferred_element_type=jnp.float32)
        o_ref[...] = (out + bo).astype(o_ref.dtype)

    return mlp_kernel


def mlp_forward(x, params):
    (w0, b0, s0, t0, w1, b1, s1, t1, wo, bo) = params
    B, D_IN = x.shape
    H0 = w0.shape[1]
    H1 = w1.shape[1]
    D_OUT = wo.shape[1]

    # ---- host-side folding of BN0 into the hidden-block linear ----
    w1f = w1 * s0.reshape(H0, 1)            # scale rows of w1
    b1f = (b1 + t0 @ w1).reshape(-1)        # shift folded into the bias

    # ---- zero-pad feature dims to lane multiples (128) for dense layouts ----
    # (for large configurable models, pad H0/H1 to 256 on v6e/v7x to fill the
    #  2x256x256 MXU; 128 is the lane-density minimum and enough here)
    H0p = _round_up(H0, 128)
    H1p = _round_up(H1, 128)
    D_OUTp = _round_up(D_OUT, 128)

    w0p = jnp.zeros((D_IN, H0p), jnp.float32).at[:, :H0].set(w0)
    w1p = jnp.zeros((H0p, H1p), jnp.float32).at[:H0, :H1].set(w1f)
    wop = jnp.zeros((H1p, D_OUTp), jnp.float32).at[:H1, :D_OUT].set(wo)

    # ---- pack the remaining per-feature f32 params into one (8, lane) tile ----
    lane = max(H0p, H1p, D_OUTp)
    pack = jnp.zeros((8, lane), jnp.float32)
    pack = pack.at[0, :H0].set(b0.reshape(-1))
    pack = pack.at[1, :H1].set(b1f)
    pack = pack.at[2, :H1].set(s1.reshape(-1))
    pack = pack.at[3, :H1].set(t1.reshape(-1))
    pack = pack.at[4, :D_OUT].set(bo.reshape(-1))

    # ---- bf16 MXU operands (elementwise math stays f32 inside the kernel) ----
    x_bf = x.astype(jnp.bfloat16)
    w0_bf = w0p.astype(jnp.bfloat16)
    w1_bf = w1p.astype(jnp.bfloat16)
    wo_bf = wop.astype(jnp.bfloat16)

    # ---- batch tile: <=512 rows; >=2 grid steps when feasible (v7x 2 TCs) ----
    tb = min(512, B)
    if pl.cdiv(B, tb) == 1 and B >= 16:
        tb = max(8, _round_up(pl.cdiv(B, 2), 8))
    grid = (pl.cdiv(B, tb),)

    # ---- explicit VMEM budget (pipelined activations + resident weights) ----
    w_bytes = 2 * (D_IN * H0p + H0p * H1p + H1p * D_OUTp) + 4 * 8 * lane
    act_bytes = 2 * (tb * D_IN * 2 + tb * D_OUTp * 4)        # in/out, 2 buffers
    live_bytes = 4 * tb * max(H0p, H1p) * 4                  # f32 intermediates
    vmem_limit = int(min(64 * 2**20,
                         max(32 * 2**20,
                             2 * (w_bytes + act_bytes + live_bytes))))

    flops = 2 * B * (D_IN * H0p + H0p * H1p + H1p * D_OUTp)
    bytes_accessed = x_bf.size * 2 + w_bytes + B * D_OUTp * 4
    cost = pl.CostEstimate(flops=flops, transcendentals=0,
                           bytes_accessed=bytes_accessed)

    kernel = make_mlp_kernel(H0p, H1p, D_OUTp)
    out_shape = jax.ShapeDtypeStruct((B, D_OUTp), jnp.float32)

    def run(single_buffer_consts):
        def const_spec(a):
            kw = {}
            if single_buffer_consts:
                # grid-invariant blocks never re-DMA; one buffer is enough
                kw["pipeline_mode"] = pl.Buffered(1)
            return pl.BlockSpec(a.shape, lambda i: (0,) * a.ndim, **kw)

        return pl.pallas_call(
            kernel,
            out_shape=out_shape,
            grid=grid,
            in_specs=[pl.BlockSpec((tb, D_IN), lambda i: (i, 0)),
                      const_spec(w0_bf),
                      const_spec(w1_bf),
                      const_spec(wo_bf),
                      const_spec(pack)],
            out_specs=pl.BlockSpec((tb, D_OUTp), lambda i: (i, 0)),
            compiler_params=pltpu.CompilerParams(
                dimension_semantics=("parallel",),
                vmem_limit_bytes=vmem_limit),
            cost_estimate=cost,
        )(x_bf, w0_bf, w1_bf, wo_bf, pack)

    try:
        out = run(single_buffer_consts=True)
    except Exception:
        # Fallback for JAX builds that reject BlockSpec(pipeline_mode=...):
        # default double-buffered constant blocks (correctness unchanged).
        out = run(single_buffer_consts=False)

    # slice away the lane-padding on the output features
    return out[:, :D_OUT]


def _linear_init(key, fan_in, fan_out):
    # PyTorch nn.Linear default init: U(-1/sqrt(fan_in), 1/sqrt(fan_in))
    kw, kb = jax.random.split(key)
    bound = 1.0 / jnp.sqrt(fan_in)
    w = jax.random.uniform(kw, (fan_in, fan_out), jnp.float32, -bound, bound)
    b = jax.random.uniform(kb, (1, fan_out), jnp.float32, -bound, bound)
    return w, b


def _bn_init(key, dim, eps=1e-5):
    kg, kb, km, kv = jax.random.split(key, 4)
    gamma = 1.0 + 0.1 * jax.random.normal(kg, (1, dim), jnp.float32)
    beta = 0.1 * jax.random.normal(kb, (1, dim), jnp.float32)
    running_mean = 0.1 * jax.random.normal(km, (1, dim), jnp.float32)
    running_var = 1.0 + 0.1 * jax.random.uniform(kv, (1, dim), jnp.float32)
    scale = gamma / jnp.sqrt(running_var + eps)
    shift = beta - running_mean * scale
    return scale, shift


def reference_forward(x, params):
    # Pure-JAX f32 reference using the ORIGINAL (unfolded) params — validates
    # the in-wrapper BN0 folding, the zero-padding and the kernel math.
    (w0, b0, s0, t0, w1, b1, s1, t1, wo, bo) = params
    h = jnp.maximum(x @ w0 + b0, 0.0)
    h = h * s0 + t0
    h = jnp.maximum(h @ w1 + b1, 0.0)
    h = h * s1 + t1
    h = jnp.maximum(h, 0.0)
    return h @ wo + bo


if __name__ == "__main__":
    # Small deterministic shapes: batch=8, input_dim=16, hidden_units=[32,32], output_dim=1
    B, D_IN, H0, H1, D_OUT = 8, 16, 32, 32, 1

    key = jax.random.PRNGKey(0)
    kx, k0, kb0, k1, kb1, ko = jax.random.split(key, 6)

    x = jax.random.normal(kx, (B, D_IN), jnp.float32)

    w0, b0 = _linear_init(k0, D_IN, H0)
    s0, t0 = _bn_init(kb0, H0)
    w1, b1 = _linear_init(k1, H0, H1)
    s1, t1 = _bn_init(kb1, H1)
    wo, bo = _linear_init(ko, H1, D_OUT)

    params = (w0, b0, s0, t0, w1, b1, s1, t1, wo, bo)

    out = mlp_forward(x, params)
    jax.block_until_ready(out)

    ref = reference_forward(x, params)
    assert out.shape == (B, D_OUT)
    # bf16 MXU operands vs f32 reference -> loosened tolerance
    assert jnp.allclose(out, ref, atol=5e-2, rtol=5e-2), "mismatch vs JAX reference"

    print("KERNEL_OK")
</pallas_src>

<mosaic_0001>
module attributes {stable_mosaic.version = 11 : i64} {
  func.func @mlp_kernel(%arg0: i32, %arg1: memref<8x16xbf16, #tpu.memory_space<vmem>>, %arg2: memref<16x128xbf16, #tpu.memory_space<vmem>>, %arg3: memref<128x128xbf16, #tpu.memory_space<vmem>>, %arg4: memref<128x128xbf16, #tpu.memory_space<vmem>>, %arg5: memref<8x128xf32, #tpu.memory_space<vmem>>, %arg6: memref<8x128xf32, #tpu.memory_space<vmem>>) attributes {dimension_semantics = [#tpu.dimension_semantics<parallel>], iteration_bounds = array<i64: 1>, scalar_prefetch = 0 : i64, scratch_operands = 0 : i64, tpu.core_type = #tpu.core_type<tc>, window_params = [{transform_indices = @transform_0, window_bounds = array<i64: 8, 16>}, {pipeline_mode = #tpu.pipeline_mode<synchronous>, transform_indices = @transform_1, window_bounds = array<i64: 16, 128>}, {pipeline_mode = #tpu.pipeline_mode<synchronous>, transform_indices = @transform_2, window_bounds = array<i64: 128, 128>}, {pipeline_mode = #tpu.pipeline_mode<synchronous>, transform_indices = @transform_3, window_bounds = array<i64: 128, 128>}, {pipeline_mode = #tpu.pipeline_mode<synchronous>, transform_indices = @transform_4, window_bounds = array<i64: 8, 128>}, {transform_indices = @transform_5, window_bounds = array<i64: 8, 128>}]} {
    %c0 = arith.constant 0 : index
    %c0_0 = arith.constant 0 : index
    %0 = vector.load %arg5[%c0, %c0_0] : memref<8x128xf32, #tpu.memory_space<vmem>>, vector<8x128xf32>
    %1 = vector.extract_strided_slice %0 {offsets = [0, 0], sizes = [1, 128], strides = [1, 1]} : vector<8x128xf32> to vector<1x128xf32>
    %2 = vector.extract_strided_slice %0 {offsets = [1, 0], sizes = [1, 128], strides = [1, 1]} : vector<8x128xf32> to vector<1x128xf32>
    %3 = vector.extract_strided_slice %0 {offsets = [2, 0], sizes = [1, 128], strides = [1, 1]} : vector<8x128xf32> to vector<1x128xf32>
    %4 = vector.extract_strided_slice %0 {offsets = [3, 0], sizes = [1, 128], strides = [1, 1]} : vector<8x128xf32> to vector<1x128xf32>
    %5 = vector.extract_strided_slice %0 {offsets = [4, 0], sizes = [1, 128], strides = [1, 1]} : vector<8x128xf32> to vector<1x128xf32>
    %c0_1 = arith.constant 0 : index
    %c0_2 = arith.constant 0 : index
    %6 = vector.load %arg1[%c0_1, %c0_2] : memref<8x16xbf16, #tpu.memory_space<vmem>>, vector<8x16xbf16>
    %c0_3 = arith.constant 0 : index
    %c0_4 = arith.constant 0 : index
    %7 = vector.load %arg2[%c0_3, %c0_4] : memref<16x128xbf16, #tpu.memory_space<vmem>>, vector<16x128xbf16>
    %cst = arith.constant dense<0.000000e+00> : vector<8x128xf32>
    %8 = tpu.matmul %6, %7, %cst {dimension_numbers = #tpu.dot_dimension_numbers<[1], [0], [0], [1], [0, 0, 1, 1], [], []>} : vector<8x16xbf16>, vector<16x128xbf16>, vector<8x128xf32> -> vector<8x128xf32>
    %9 = vector.broadcast %1 : vector<1x128xf32> to vector<8x128xf32>
    %10 = arith.addf %8, %9 : vector<8x128xf32>
    %cst_5 = arith.constant 0.000000e+00 : f32
    %11 = vector.broadcast %cst_5 : f32 to vector<8x128xf32>
    %12 = arith.maximumf %10, %11 : vector<8x128xf32>
    %13 = arith.truncf %12 : vector<8x128xf32> to vector<8x128xbf16>
    %c0_6 = arith.constant 0 : index
    %c0_7 = arith.constant 0 : index
    %14 = vector.load %arg3[%c0_6, %c0_7] : memref<128x128xbf16, #tpu.memory_space<vmem>>, vector<128x128xbf16>
    %cst_8 = arith.constant dense<0.000000e+00> : vector<8x128xf32>
    %15 = tpu.matmul %13, %14, %cst_8 {dimension_numbers = #tpu.dot_dimension_numbers<[1], [0], [0], [1], [0, 0, 1, 1], [], []>} : vector<8x128xbf16>, vector<128x128xbf16>, vector<8x128xf32> -> vector<8x128xf32>
    %16 = vector.broadcast %2 : vector<1x128xf32> to vector<8x128xf32>
    %17 = arith.addf %15, %16 : vector<8x128xf32>
    %cst_9 = arith.constant 0.000000e+00 : f32
    %18 = vector.broadcast %cst_9 : f32 to vector<8x128xf32>
    %19 = arith.maximumf %17, %18 : vector<8x128xf32>
    %20 = vector.broadcast %3 : vector<1x128xf32> to vector<8x128xf32>
    %21 = arith.mulf %19, %20 : vector<8x128xf32>
    %22 = vector.broadcast %4 : vector<1x128xf32> to vector<8x128xf32>
    %23 = arith.addf %21, %22 : vector<8x128xf32>
    %cst_10 = arith.constant 0.000000e+00 : f32
    %24 = vector.broadcast %cst_10 : f32 to vector<8x128xf32>
    %25 = arith.maximumf %23, %24 : vector<8x128xf32>
    %26 = arith.truncf %25 : vector<8x128xf32> to vector<8x128xbf16>
    %c0_11 = arith.constant 0 : index
    %c0_12 = arith.constant 0 : index
    %27 = vector.load %arg4[%c0_11, %c0_12] : memref<128x128xbf16, #tpu.memory_space<vmem>>, vector<128x128xbf16>
    %cst_13 = arith.constant dense<0.000000e+00> : vector<8x128xf32>
    %28 = tpu.matmul %26, %27, %cst_13 {dimension_numbers = #tpu.dot_dimension_numbers<[1], [0], [0], [1], [0, 0, 1, 1], [], []>} : vector<8x128xbf16>, vector<128x128xbf16>, vector<8x128xf32> -> vector<8x128xf32>
    %29 = vector.broadcast %5 : vector<1x128xf32> to vector<8x128xf32>
    %30 = arith.addf %28, %29 : vector<8x128xf32>
    %c0_14 = arith.constant 0 : index
    %c0_15 = arith.constant 0 : index
    %31 = vector.load %arg6[%c0_14, %c0_15] : memref<8x128xf32, #tpu.memory_space<vmem>>, vector<8x128xf32>
    tpu.vector_store %arg6[%c0_14, %c0_15], %30 {strides = array<i32>} : memref<8x128xf32, #tpu.memory_space<vmem>>, vector<8x128xf32>,
    return
  }
  func.func @transform_0(%arg0: i32) -> (i32, i32) {
    %c0_i32 = arith.constant 0 : i32
    %c0_i32_0 = arith.constant 0 : i32
    return %arg0, %c0_i32 : i32, i32
  }
  func.func @transform_1(%arg0: i32) -> (i32, i32) {
    %c0_i32 = arith.constant 0 : i32
    %c0_i32_0 = arith.constant 0 : i32
    %c0_i32_1 = arith.constant 0 : i32
    return %c0_i32, %c0_i32_0 : i32, i32
  }
  func.func @transform_2(%arg0: i32) -> (i32, i32) {
    %c0_i32 = arith.constant 0 : i32
    %c0_i32_0 = arith.constant 0 : i32
    %c0_i32_1 = arith.constant 0 : i32
    return %c0_i32, %c0_i32_0 : i32, i32
  }
  func.func @transform_3(%arg0: i32) -> (i32, i32) {
    %c0_i32 = arith.constant 0 : i32
    %c0_i32_0 = arith.constant 0 : i32
    %c0_i32_1 = arith.constant 0 : i32
    return %c0_i32, %c0_i32_0 : i32, i32
  }
  func.func @transform_4(%arg0: i32) -> (i32, i32) {
    %c0_i32 = arith.constant 0 : i32
    %c0_i32_0 = arith.constant 0 : i32
    %c0_i32_1 = arith.constant 0 : i32
    return %c0_i32, %c0_i32_0 : i32, i32
  }
  func.func @transform_5(%arg0: i32) -> (i32, i32) {
    %c0_i32 = arith.constant 0 : i32
    %c0_i32_0 = arith.constant 0 : i32
    return %arg0, %c0_i32 : i32, i32
  }
}

module attributes {stable_mosaic.version = 11 : i64} {
  func.func @mlp_kernel(%arg0: i32, %arg1: memref<8x16xbf16, #tpu.memory_space<vmem>>, %arg2: memref<16x128xbf16, #tpu.memory_space<vmem>>, %arg3: memref<128x128xbf16, #tpu.memory_space<vmem>>, %arg4: memref<128x128xbf16, #tpu.memory_space<vmem>>, %arg5: memref<8x128xf32, #tpu.memory_space<vmem>>, %arg6: memref<8x128xf32, #tpu.memory_space<vmem>>) attributes {dimension_semantics = [#tpu.dimension_semantics<parallel>], iteration_bounds = array<i64: 1>, scalar_prefetch = 0 : i64, scratch_operands = 0 : i64, tpu.core_type = #tpu.core_type<tc>, window_params = [{transform_indices = @transform_0, window_bounds = array<i64: 8, 16>}, {pipeline_mode = #tpu.pipeline_mode<synchronous>, transform_indices = @transform_1, window_bounds = array<i64: 16, 128>}, {pipeline_mode = #tpu.pipeline_mode<synchronous>, transform_indices = @transform_2, window_bounds = array<i64: 128, 128>}, {pipeline_mode = #tpu.pipeline_mode<synchronous>, transform_indices = @transform_3, window_bounds = array<i64: 128, 128>}, {pipeline_mode = #tpu.pipeline_mode<synchronous>, transform_indices = @transform_4, window_bounds = array<i64: 8, 128>}, {transform_indices = @transform_5, window_bounds = array<i64: 8, 128>}]} {
    %c0 = arith.constant 0 : index
    %c0_0 = arith.constant 0 : index
    %0 = vector.load %arg5[%c0, %c0_0] : memref<8x128xf32, #tpu.memory_space<vmem>>, vector<8x128xf32>
    %1 = vector.extract_strided_slice %0 {offsets = [0, 0], sizes = [1, 128], strides = [1, 1]} : vector<8x128xf32> to vector<1x128xf32>
    %2 = vector.extract_strided_slice %0 {offsets = [1, 0], sizes = [1, 128], strides = [1, 1]} : vector<8x128xf32> to vector<1x128xf32>
    %3 = vector.extract_strided_slice %0 {offsets = [2, 0], sizes = [1, 128], strides = [1, 1]} : vector<8x128xf32> to vector<1x128xf32>
    %4 = vector.extract_strided_slice %0 {offsets = [3, 0], sizes = [1, 128], strides = [1, 1]} : vector<8x128xf32> to vector<1x128xf32>
    %5 = vector.extract_strided_slice %0 {offsets = [4, 0], sizes = [1, 128], strides = [1, 1]} : vector<8x128xf32> to vector<1x128xf32>
    %c0_1 = arith.constant 0 : index
    %c0_2 = arith.constant 0 : index
    %6 = vector.load %arg1[%c0_1, %c0_2] : memref<8x16xbf16, #tpu.memory_space<vmem>>, vector<8x16xbf16>
    %c0_3 = arith.constant 0 : index
    %c0_4 = arith.constant 0 : index
    %7 = vector.load %arg2[%c0_3, %c0_4] : memref<16x128xbf16, #tpu.memory_space<vmem>>, vector<16x128xbf16>
    %cst = arith.constant dense<0.000000e+00> : vector<8x128xf32>
    %8 = tpu.matmul %6, %7, %cst {dimension_numbers = #tpu.dot_dimension_numbers<[1], [0], [0], [1], [0, 0, 1, 1], [], []>} : vector<8x16xbf16>, vector<16x128xbf16>, vector<8x128xf32> -> vector<8x128xf32>
    %9 = vector.broadcast %1 : vector<1x128xf32> to vector<8x128xf32>
    %10 = arith.addf %8, %9 : vector<8x128xf32>
    %cst_5 = arith.constant 0.000000e+00 : f32
    %11 = vector.broadcast %cst_5 : f32 to vector<8x128xf32>
    %12 = arith.maximumf %10, %11 : vector<8x128xf32>
    %13 = arith.truncf %12 : vector<8x128xf32> to vector<8x128xbf16>
    %c0_6 = arith.constant 0 : index
    %c0_7 = arith.constant 0 : index
    %14 = vector.load %arg3[%c0_6, %c0_7] : memref<128x128xbf16, #tpu.memory_space<vmem>>, vector<128x128xbf16>
    %cst_8 = arith.constant dense<0.000000e+00> : vector<8x128xf32>
    %15 = tpu.matmul %13, %14, %cst_8 {dimension_numbers = #tpu.dot_dimension_numbers<[1], [0], [0], [1], [0, 0, 1, 1], [], []>} : vector<8x128xbf16>, vector<128x128xbf16>, vector<8x128xf32> -> vector<8x128xf32>
    %16 = vector.broadcast %2 : vector<1x128xf32> to vector<8x128xf32>
    %17 = arith.addf %15, %16 : vector<8x128xf32>
    %cst_9 = arith.constant 0.000000e+00 : f32
    %18 = vector.broadcast %cst_9 : f32 to vector<8x128xf32>
    %19 = arith.maximumf %17, %18 : vector<8x128xf32>
    %20 = vector.broadcast %3 : vector<1x128xf32> to vector<8x128xf32>
    %21 = arith.mulf %19, %20 : vector<8x128xf32>
    %22 = vector.broadcast %4 : vector<1x128xf32> to vector<8x128xf32>
    %23 = arith.addf %21, %22 : vector<8x128xf32>
    %cst_10 = arith.constant 0.000000e+00 : f32
    %24 = vector.broadcast %cst_10 : f32 to vector<8x128xf32>
    %25 = arith.maximumf %23, %24 : vector<8x128xf32>
    %26 = arith.truncf %25 : vector<8x128xf32> to vector<8x128xbf16>
    %c0_11 = arith.constant 0 : index
    %c0_12 = arith.constant 0 : index
    %27 = vector.load %arg4[%c0_11, %c0_12] : memref<128x128xbf16, #tpu.memory_space<vmem>>, vector<128x128xbf16>
    %cst_13 = arith.constant dense<0.000000e+00> : vector<8x128xf32>
    %28 = tpu.matmul %26, %27, %cst_13 {dimension_numbers = #tpu.dot_dimension_numbers<[1], [0], [0], [1], [0, 0, 1, 1], [], []>} : vector<8x128xbf16>, vector<128x128xbf16>, vector<8x128xf32> -> vector<8x128xf32>
    %29 = vector.broadcast %5 : vector<1x128xf32> to vector<8x128xf32>
    %30 = arith.addf %28, %29 : vector<8x128xf32>
    %c0_14 = arith.constant 0 : index
    %c0_15 = arith.constant 0 : index
    %31 = vector.load %arg6[%c0_14, %c0_15] : memref<8x128xf32, #tpu.memory_space<vmem>>, vector<8x128xf32>
    tpu.vector_store %arg6[%c0_14, %c0_15], %30 {strides = array<i32>} : memref<8x128xf32, #tpu.memory_space<vmem>>, vector<8x128xf32>,
    return
  }
  func.func @transform_0(%arg0: i32) -> (i32, i32) {
    %c0_i32 = arith.constant 0 : i32
    %c0_i32_0 = arith.constant 0 : i32
    return %arg0, %c0_i32 : i32, i32
  }
  func.func @transform_1(%arg0: i32) -> (i32, i32) {
    %c0_i32 = arith.constant 0 : i32
    %c0_i32_0 = arith.constant 0 : i32
    %c0_i32_1 = arith.constant 0 : i32
    return %c0_i32, %c0_i32_0 : i32, i32
  }
  func.func @transform_2(%arg0: i32) -> (i32, i32) {
    %c0_i32 = arith.constant 0 : i32
    %c0_i32_0 = arith.constant 0 : i32
    %c0_i32_1 = arith.constant 0 : i32
    return %c0_i32, %c0_i32_0 : i32, i32
  }
  func.func @transform_3(%arg0: i32) -> (i32, i32) {
    %c0_i32 = arith.constant 0 : i32
    %c0_i32_0 = arith.constant 0 : i32
    %c0_i32_1 = arith.constant 0 : i32
    return %c0_i32, %c0_i32_0 : i32, i32
  }
  func.func @transform_4(%arg0: i32) -> (i32, i32) {
    %c0_i32 = arith.constant 0 : i32
    %c0_i32_0 = arith.constant 0 : i32
    %c0_i32_1 = arith.constant 0 : i32
    return %c0_i32, %c0_i32_0 : i32, i32
  }
  func.func @transform_5(%arg0: i32) -> (i32, i32) {
    %c0_i32 = arith.constant 0 : i32
    %c0_i32_0 = arith.constant 0 : i32
    return %arg0, %c0_i32 : i32, i32
  }
}

</mosaic_0001>

<bundles_post_ra>
// kernel: tpu_custom_call.1
= control target key start
LH: loop header
LB: loop body
LE: loop exit
PB: predicated region body
PF: predicated region fallthrough
CT: control target
= control target key end

     0   :  { %10 = vsyncpa [#allocation3], 0  ;;  %s611_s0 = inlined_call_operand.hbm [shape: bf16[8,16], index: 0, kind: input, shape index: {}]   ;;  %s612_s1 = inlined_call_operand.hbm [shape: bf16[16,128], index: 1, kind: input, shape index: {}]   ;;  %s613_s2 = inlined_call_operand.hbm [shape: bf16[128,128], index: 2, kind: input, shape index: {}]   ;;  %s614_s3 = inlined_call_operand.hbm [shape: bf16[128,128], index: 3, kind: input, shape index: {}]   ;;  %s615_s4 = inlined_call_operand.hbm [shape: f32[8,128], index: 4, kind: input, shape index: {}]   ;;  %s616_s5 = inlined_call_operand.hbm [shape: f32[8,128], index: 5, kind: output, shape index: {}]  }
   0x1   :  { %11 = vsyncpa [#allocation6], 0 }
   0x2   :  { %12 = vsyncpa [#allocation9], 0  ;;  %s29_s20 = sshll.u32 %s612_s1, 4  ;;  %s30_s20 = int_to_ptr.hbm [resolvable:$true] %s29_s20 }
   0x3   :  { %13 = vsyncpa [#allocation4], 0  ;;  %s555_s21 = smov [#allocation5]   ;;  %s55_s25 = sshll.u32 %s614_s3, 4  ;;  %s56_s25 = int_to_ptr.hbm [resolvable:$true] %s55_s25 }
   0x4   :  { %s31_s22 = sshll.u32 %s555_s21, 4  ;;  %s556_s26 = smov 64   ;;  %s32_s22 = int_to_ptr.vmem [resolvable:$true] %s31_s22 }
   0x5   :  { %s557_s27 = smov 4   ;;  %s558_s28 = smov [#allocation8]  }
   0x6   :  { %37 = dma.hbm_to_vmem [thread:$0]  %s30_s20, 128, %s32_s22, [#allocation6], %s556_s26, %s556_s26, %s557_s27  }
   0x7   :  { %s57_s29 = sshll.u32 %s558_s28, 4  ;;  %s19_s7 = sshll.u32 %s611_s0, 4  ;;  %s58_s29 = int_to_ptr.vmem [resolvable:$true] %s57_s29  ;;  %s20_s7 = int_to_ptr.hbm [resolvable:$true] %s19_s7 }
   0x8   :  { %63 = dma.hbm_to_vmem [thread:$0]  %s56_s25, 1024, %s58_s29, [#allocation9], %s556_s26, %s556_s26, %s557_s27  }
   0x9   :  { %s42_s9 = sshll.u32 %s613_s2, 4  ;;  %s559_s10 = smov [#allocation2]   ;;  %s43_s9 = int_to_ptr.hbm [resolvable:$true] %s42_s9 }
   0xa   :  { %s21_s11 = sshll.u32 %s559_s10, 4  ;;  %s560_s3 = smov [#allocation7]   ;;  %s22_s11 = int_to_ptr.vmem [resolvable:$true] %s21_s11 }
   0xb   :  { %24 = dma.hbm_to_vmem [thread:$0]  %s20_s7, 64, %s22_s11, [#allocation3]  }
   0xc   :  { %s44_s12 = sshll.u32 %s560_s3, 4  ;;  %s69_s15 = sshll.u32 %s615_s4, 4  ;;  %s45_s12 = int_to_ptr.vmem [resolvable:$true] %s44_s12  ;;  %s70_s15 = int_to_ptr.hbm [resolvable:$true] %s69_s15 }
   0xd   :  { %50 = dma.hbm_to_vmem [thread:$0]  %s43_s9, 1024, %s45_s12, [#allocation6], %s556_s26, %s556_s26, %s557_s27  }
   0xe   :  { %s561_s0 = smov [#allocation10]  }
   0xf   :  { %s71_s16 = sshll.u32 %s561_s0, 4  ;;  %s72_s16 = int_to_ptr.vmem [resolvable:$true] %s71_s16 }
  0x10   :  { %74 = dma.hbm_to_vmem [thread:$0]  %s70_s15, 128, %s72_s16, [#allocation9]  }
  0x11   :  { %547 = dma.done.wait [#allocation3], 64  }
  0x12   :  { %548 = vsyncadd [#allocation3], 4294967232 }
  0x13   :  { %549 = dma.done.wait [#allocation6], 1152  }
  0x14   :  { %550 = vsyncadd [#allocation6], 4294966144 }
  0x15   :  { %551 = dma.done.wait [#allocation9], 1152  }
  0x16   :  { %552 = vsyncadd [#allocation9], 4294966144  ;;  %v378_v0 = vld [vmem:[#allocation5] sm:$0xff]  ;;  %v97_v2 = vld [vmem:[#allocation2] sm:$0xf]  ;;  %vm107_vm0 = vcmask 130048  }
  0x17   :  { %v386_v1 = vld [vmem:[#allocation7 + $0x38] sm:$0xff]  ;;  %118 = vmatpush.bf16.msra.mxu0 %v378_v0  ;;  %v385_v3 = vld [vmem:[#allocation7 + $0x30] sm:$0xff]  ;;  %v384_v4 = vld [vmem:[#allocation7 + $0x28] sm:$0xff]  ;;  %s562_s2 = smov [#allocation11]   ;;  %s297_s19 = sshll.u32 %s616_s5, 4  ;;  %s298_s19 = int_to_ptr.hbm [resolvable:$true] %s297_s19 }
  0x18   :  { %191 = vmatpush.bf16.msra.mxu1 %v386_v1  ;;  %v383_v5 = vld [vmem:[#allocation7 + $0x20] sm:$0xff]  ;;  %v382_v6 = vld [vmem:[#allocation7 + $0x18] sm:$0xff]  ;;  %v381_v7 = vld [vmem:[#allocation7 + $0x10] sm:$0xff]  ;;  %s295_s4 = sshll.u32 %s562_s2, 4  ;;  %s296_s4 = int_to_ptr.vmem [resolvable:$true] %s295_s4 }
  0x19   :  { %v380_v8 = vld [vmem:[#allocation7 + $0x8] sm:$0xff]  ;;  %v379_v9 = vld [vmem:[#allocation7] sm:$0xff]  ;;  %v394_v10 = vld [vmem:[#allocation8 + $0x38] sm:$0xff] }
  0x1a   :  { %313 = vmatmul.msk.bf16.vlgmr.msra.gmra.mxu0 %vm107_vm0, %v97_v2  ;;  %276 = vmatpush.bf16.msra.mxu2 %v394_v10  ;;  %v393_v11 = vld [vmem:[#allocation8 + $0x30] sm:$0xff]  ;;  %v392_v12 = vld [vmem:[#allocation8 + $0x28] sm:$0xff]  ;;  %v391_v13 = vld [vmem:[#allocation8 + $0x20] sm:$0xff] }
  0x1b   :  { %v390_v14 = vld [vmem:[#allocation8 + $0x18] sm:$0xff]  ;;  %v96_v15 = vld [vmem:[#allocation10] sm:$0xff]  ;;  %v389_v22 = vld [vmem:[#allocation8 + $0x10] sm:$0xff] }
  0x1c   :  { %192 = vmatpush.bf16.msra.mxu1 %v385_v3  ;;  %v100_v16 = vperm.slane %v96_v15, 0  ;;  %v388_v23 = vld [vmem:[#allocation8 + $0x8] sm:$0xff]  ;;  %v387_v24 = vld [vmem:[#allocation8] sm:$0xff]  ;;  %v142_v25 = vperm.slane %v96_v15, 1  ;;  %v205_v28 = vperm.slane %v96_v15, 2  ;;  %v207_v30 = vperm.slane %v96_v15, 3 }
  0x1d   :  { %v227_v36 = vperm.slane %v96_v15, 4 }
  0x1e   :  { %277 = vmatpush.bf16.msra.mxu2 %v393_v11 }
  0x20   :  { %193 = vmatpush.bf16.msra.mxu1 %v384_v4 }
  0x22   :  { %278 = vmatpush.bf16.msra.mxu2 %v392_v12 }
  0x24   :  { %194 = vmatpush.bf16.msra.mxu1 %v383_v5 }
  0x26   :  { %279 = vmatpush.bf16.msra.mxu2 %v391_v13 }
  0x28   :  { %195 = vmatpush.bf16.msra.mxu1 %v382_v6 }
  0x2a   :  { %280 = vmatpush.bf16.msra.mxu2 %v390_v14 }
  0x2c   :  { %196 = vmatpush.bf16.msra.mxu1 %v381_v7 }
  0x2e   :  { %281 = vmatpush.bf16.msra.mxu2 %v389_v22 }
  0x30   :  { %197 = vmatpush.bf16.msra.mxu1 %v380_v8 }
  0x32   :  { %282 = vmatpush.bf16.msra.mxu2 %v388_v23 }
  0x34   :  { %198 = vmatpush.bf16.msra.mxu1 %v379_v9 }
  0x36   :  { %283 = vmatpush.bf16.msra.mxu2 %v387_v24 }
  0x97   :  { %v120_v17 = vpop.f32.mrf.mxu0 }
  0x98   :  { %v121_v18 = vadd.f32 %v120_v17, %v100_v16 }
  0x9a   :  { %v124_v19 = vmax.f32 %v121_v18, 0.0 }
  0x9c   :  { %v125_v20 = vpack.c.bf16 %v124_v19, %v124_v19 }
  0x9e   :  { %199 = vmatmul.bf16.vlgmr.msra.gmra.mxu1 %v125_v20 }
  0x9f   :  { %v122_v21 = vpop.f32.mrf.mxu0 }
 0x11b   :  { %v200_v26 = vpop.f32.mrf.mxu1 }
 0x11c   :  { %v201_v27 = vadd.f32 %v200_v26, %v142_v25 }
 0x11e   :  { %v204_v29 = vmax.f32 %v201_v27, 0.0 }
 0x120   :  { %v206_v31 = vmul.f32 %v205_v28, %v204_v29 }
 0x122   :  { %v208_v32 = vadd.f32 %v207_v30, %v206_v31 }
 0x123   :  { %v202_v33 = vpop.f32.mrf.mxu1 }
 0x124   :  { %v209_v34 = vmax.f32 %v208_v32, 0.0 }
 0x126   :  { %v210_v35 = vpack.c.bf16 %v209_v34, %v209_v34 }
 0x128   :  { %284 = vmatmul.bf16.vlgmr.msra.gmra.mxu2 %v210_v35 }
 0x1ab   :  { %v285_v37 = vpop.f32.mrf.mxu2 }
 0x1ac   :  { %v286_v38 = vadd.f32 %v285_v37, %v227_v36 }
 0x1ae   :  { %289 = vst [vmem:[#allocation11] sm:$0xff] %v286_v38 }
 0x1af   :  { %300 = dma.vmem_to_hbm [thread:$0]  %s296_s4, 128, %s298_s19, [#allocation4]  }
 0x1b3   :  { %v287_v39 = vpop.f32.mrf.mxu2 }
 0x1b4   :  { %553 = dma.done.wait [#allocation4], 128  }
 0x1b5   :  { %554 = vsyncadd [#allocation4], 4294967168 }
 0x1b6   :  { %305 = vsyncpa [#allocation3], 1 }
 0x1b7   :  { %306 = vsyncpa [#allocation6], 1 }
 0x1b8   :  { %307 = vsyncpa [#allocation9], 1 }
 0x1b9   :  { %308 = vsyncpa [#allocation4], 1 }

// kernel: tpu_custom_call.1
= control target key start
LH: loop header
LB: loop body
LE: loop exit
PB: predicated region body
PF: predicated region fallthrough
CT: control target
= control target key end

     0   :  { %10 = vsyncpa [#allocation3], 0  ;;  %s611_s0 = inlined_call_operand.hbm [shape: bf16[8,16], index: 0, kind: input, shape index: {}]   ;;  %s612_s1 = inlined_call_operand.hbm [shape: bf16[16,128], index: 1, kind: input, shape index: {}]   ;;  %s613_s2 = inlined_call_operand.hbm [shape: bf16[128,128], index: 2, kind: input, shape index: {}]   ;;  %s614_s3 = inlined_call_operand.hbm [shape: bf16[128,128], index: 3, kind: input, shape index: {}]   ;;  %s615_s4 = inlined_call_operand.hbm [shape: f32[8,128], index: 4, kind: input, shape index: {}]   ;;  %s616_s5 = inlined_call_operand.hbm [shape: f32[8,128], index: 5, kind: output, shape index: {}]  }
   0x1   :  { %11 = vsyncpa [#allocation6], 0 }
   0x2   :  { %12 = vsyncpa [#allocation9], 0  ;;  %s29_s20 = sshll.u32 %s612_s1, 4  ;;  %s30_s20 = int_to_ptr.hbm [resolvable:$true] %s29_s20 }
   0x3   :  { %13 = vsyncpa [#allocation4], 0  ;;  %s555_s21 = smov [#allocation5]   ;;  %s55_s25 = sshll.u32 %s614_s3, 4  ;;  %s56_s25 = int_to_ptr.hbm [resolvable:$true] %s55_s25 }
   0x4   :  { %s31_s22 = sshll.u32 %s555_s21, 4  ;;  %s556_s26 = smov 64   ;;  %s32_s22 = int_to_ptr.vmem [resolvable:$true] %s31_s22 }
   0x5   :  { %s557_s27 = smov 4   ;;  %s558_s28 = smov [#allocation8]  }
   0x6   :  { %37 = dma.hbm_to_vmem [thread:$0]  %s30_s20, 128, %s32_s22, [#allocation6], %s556_s26, %s556_s26, %s557_s27  }
   0x7   :  { %s57_s29 = sshll.u32 %s558_s28, 4  ;;  %s19_s7 = sshll.u32 %s611_s0, 4  ;;  %s58_s29 = int_to_ptr.vmem [resolvable:$true] %s57_s29  ;;  %s20_s7 = int_to_ptr.hbm [resolvable:$true] %s19_s7 }
   0x8   :  { %63 = dma.hbm_to_vmem [thread:$0]  %s56_s25, 1024, %s58_s29, [#allocation9], %s556_s26, %s556_s26, %s557_s27  }
   0x9   :  { %s42_s9 = sshll.u32 %s613_s2, 4  ;;  %s559_s10 = smov [#allocation2]   ;;  %s43_s9 = int_to_ptr.hbm [resolvable:$true] %s42_s9 }
   0xa   :  { %s21_s11 = sshll.u32 %s559_s10, 4  ;;  %s560_s3 = smov [#allocation7]   ;;  %s22_s11 = int_to_ptr.vmem [resolvable:$true] %s21_s11 }
   0xb   :  { %24 = dma.hbm_to_vmem [thread:$0]  %s20_s7, 64, %s22_s11, [#allocation3]  }
   0xc   :  { %s44_s12 = sshll.u32 %s560_s3, 4  ;;  %s69_s15 = sshll.u32 %s615_s4, 4  ;;  %s45_s12 = int_to_ptr.vmem [resolvable:$true] %s44_s12  ;;  %s70_s15 = int_to_ptr.hbm [resolvable:$true] %s69_s15 }
   0xd   :  { %50 = dma.hbm_to_vmem [thread:$0]  %s43_s9, 1024, %s45_s12, [#allocation6], %s556_s26, %s556_s26, %s557_s27  }
   0xe   :  { %s561_s0 = smov [#allocation10]  }
   0xf   :  { %s71_s16 = sshll.u32 %s561_s0, 4  ;;  %s72_s16 = int_to_ptr.vmem [resolvable:$true] %s71_s16 }
  0x10   :  { %74 = dma.hbm_to_vmem [thread:$0]  %s70_s15, 128, %s72_s16, [#allocation9]  }
  0x11   :  { %547 = dma.done.wait [#allocation3], 64  }
  0x12   :  { %548 = vsyncadd [#allocation3], 4294967232 }
  0x13   :  { %549 = dma.done.wait [#allocation6], 1152  }
  0x14   :  { %550 = vsyncadd [#allocation6], 4294966144 }
  0x15   :  { %551 = dma.done.wait [#allocation9], 1152  }
  0x16   :  { %552 = vsyncadd [#allocation9], 4294966144  ;;  %v378_v0 = vld [vmem:[#allocation5] sm:$0xff]  ;;  %v97_v2 = vld [vmem:[#allocation2] sm:$0xf]  ;;  %vm107_vm0 = vcmask 130048  }
  0x17   :  { %v386_v1 = vld [vmem:[#allocation7 + $0x38] sm:$0xff]  ;;  %118 = vmatpush.bf16.msra.mxu0 %v378_v0  ;;  %v385_v3 = vld [vmem:[#allocation7 + $0x30] sm:$0xff]  ;;  %v384_v4 = vld [vmem:[#allocation7 + $0x28] sm:$0xff]  ;;  %s562_s2 = smov [#allocation11]   ;;  %s297_s19 = sshll.u32 %s616_s5, 4  ;;  %s298_s19 = int_to_ptr.hbm [resolvable:$true] %s297_s19 }
  0x18   :  { %191 = vmatpush.bf16.msra.mxu1 %v386_v1  ;;  %v383_v5 = vld [vmem:[#allocation7 + $0x20] sm:$0xff]  ;;  %v382_v6 = vld [vmem:[#allocation7 + $0x18] sm:$0xff]  ;;  %v381_v7 = vld [vmem:[#allocation7 + $0x10] sm:$0xff]  ;;  %s295_s4 = sshll.u32 %s562_s2, 4  ;;  %s296_s4 = int_to_ptr.vmem [resolvable:$true] %s295_s4 }
  0x19   :  { %v380_v8 = vld [vmem:[#allocation7 + $0x8] sm:$0xff]  ;;  %v379_v9 = vld [vmem:[#allocation7] sm:$0xff]  ;;  %v394_v10 = vld [vmem:[#allocation8 + $0x38] sm:$0xff] }
  0x1a   :  { %313 = vmatmul.msk.bf16.vlgmr.msra.gmra.mxu0 %vm107_vm0, %v97_v2  ;;  %276 = vmatpush.bf16.msra.mxu2 %v394_v10  ;;  %v393_v11 = vld [vmem:[#allocation8 + $0x30] sm:$0xff]  ;;  %v392_v12 = vld [vmem:[#allocation8 + $0x28] sm:$0xff]  ;;  %v391_v13 = vld [vmem:[#allocation8 + $0x20] sm:$0xff] }
  0x1b   :  { %v390_v14 = vld [vmem:[#allocation8 + $0x18] sm:$0xff]  ;;  %v96_v15 = vld [vmem:[#allocation10] sm:$0xff]  ;;  %v389_v22 = vld [vmem:[#allocation8 + $0x10] sm:$0xff] }
  0x1c   :  { %192 = vmatpush.bf16.msra.mxu1 %v385_v3  ;;  %v100_v16 = vperm.slane %v96_v15, 0  ;;  %v388_v23 = vld [vmem:[#allocation8 + $0x8] sm:$0xff]  ;;  %v387_v24 = vld [vmem:[#allocation8] sm:$0xff]  ;;  %v142_v25 = vperm.slane %v96_v15, 1  ;;  %v205_v28 = vperm.slane %v96_v15, 2  ;;  %v207_v30 = vperm.slane %v96_v15, 3 }
  0x1d   :  { %v227_v36 = vperm.slane %v96_v15, 4 }
  0x1e   :  { %277 = vmatpush.bf16.msra.mxu2 %v393_v11 }
  0x20   :  { %193 = vmatpush.bf16.msra.mxu1 %v384_v4 }
  0x22   :  { %278 = vmatpush.bf16.msra.mxu2 %v392_v12 }
  0x24   :  { %194 = vmatpush.bf16.msra.mxu1 %v383_v5 }
  0x26   :  { %279 = vmatpush.bf16.msra.mxu2 %v391_v13 }
  0x28   :  { %195 = vmatpush.bf16.msra.mxu1 %v382_v6 }
  0x2a   :  { %280 = vmatpush.bf16.msra.mxu2 %v390_v14 }
  0x2c   :  { %196 = vmatpush.bf16.msra.mxu1 %v381_v7 }
  0x2e   :  { %281 = vmatpush.bf16.msra.mxu2 %v389_v22 }
  0x30   :  { %197 = vmatpush.bf16.msra.mxu1 %v380_v8 }
  0x32   :  { %282 = vmatpush.bf16.msra.mxu2 %v388_v23 }
  0x34   :  { %198 = vmatpush.bf16.msra.mxu1 %v379_v9 }
  0x36   :  { %283 = vmatpush.bf16.msra.mxu2 %v387_v24 }
  0x97   :  { %v120_v17 = vpop.f32.mrf.mxu0 }
  0x98   :  { %v121_v18 = vadd.f32 %v120_v17, %v100_v16 }
  0x9a   :  { %v124_v19 = vmax.f32 %v121_v18, 0.0 }
  0x9c   :  { %v125_v20 = vpack.c.bf16 %v124_v19, %v124_v19 }
  0x9e   :  { %199 = vmatmul.bf16.vlgmr.msra.gmra.mxu1 %v125_v20 }
  0x9f   :  { %v122_v21 = vpop.f32.mrf.mxu0 }
 0x11b   :  { %v200_v26 = vpop.f32.mrf.mxu1 }
 0x11c   :  { %v201_v27 = vadd.f32 %v200_v26, %v142_v25 }
 0x11e   :  { %v204_v29 = vmax.f32 %v201_v27, 0.0 }
 0x120   :  { %v206_v31 = vmul.f32 %v205_v28, %v204_v29 }
 0x122   :  { %v208_v32 = vadd.f32 %v207_v30, %v206_v31 }
 0x123   :  { %v202_v33 = vpop.f32.mrf.mxu1 }
 0x124   :  { %v209_v34 = vmax.f32 %v208_v32, 0.0 }
 0x126   :  { %v210_v35 = vpack.c.bf16 %v209_v34, %v209_v34 }
 0x128   :  { %284 = vmatmul.bf16.vlgmr.msra.gmra.mxu2 %v210_v35 }
 0x1ab   :  { %v285_v37 = vpop.f32.mrf.mxu2 }
 0x1ac   :  { %v286_v38 = vadd.f32 %v285_v37, %v227_v36 }
 0x1ae   :  { %289 = vst [vmem:[#allocation11] sm:$0xff] %v286_v38 }
 0x1af   :  { %300 = dma.vmem_to_hbm [thread:$0]  %s296_s4, 128, %s298_s19, [#allocation4]  }
 0x1b3   :  { %v287_v39 = vpop.f32.mrf.mxu2 }
 0x1b4   :  { %553 = dma.done.wait [#allocation4], 128  }
 0x1b5   :  { %554 = vsyncadd [#allocation4], 4294967168 }
 0x1b6   :  { %305 = vsyncpa [#allocation3], 1 }
 0x1b7   :  { %306 = vsyncpa [#allocation6], 1 }
 0x1b8   :  { %307 = vsyncpa [#allocation9], 1 }
 0x1b9   :  { %308 = vsyncpa [#allocation4], 1 }

</bundles_post_ra>
